<compile_context>
chip_gen: v7x
topology: tpu7x:2x2x1
jax: 0.10.0
libtpu: 0.0.40
codegen_flags: <defaults>
</compile_context>

<pallas_src>
import functools

import jax
import jax.numpy as jnp
from jax.experimental import pallas as pl
from jax.experimental.pallas import tpu as pltpu


def _hyper_dropout_kernel(bits_ref, x_ref, o_ref, *, thresh, scale, n_divs, sub):
    # Shared keep-mask for this row tile: integer threshold on raw bits.
    # bits are uniform in [0, 2^24), so P(keep) = thresh / 2^24 = 1 - p.
    keep = bits_ref[...] < thresh                      # (TB, sub) bool
    mask = jnp.where(
        keep,
        jnp.asarray(scale, dtype=x_ref.dtype),
        jnp.asarray(0.0, dtype=x_ref.dtype),
    )                                                  # (TB, sub) in x.dtype

    # Reuse the sub-wide mask for every hypercomplex component via static,
    # lane-aligned slices (no tiled full-width mask is materialized).
    for d in range(n_divs):
        sl = slice(d * sub, (d + 1) * sub)
        o_ref[:, sl] = x_ref[:, sl] * mask


def _choose_row_tile(B, F, itemsize, target_bytes=2 << 20):
    """Pick a row-tile so one x block is a few MiB (multiple of 8 rows)."""
    rows = target_bytes // max(1, F * itemsize)
    rows = int(rows) - int(rows) % 8
    rows = max(8, rows)
    return B if rows >= B else rows


def hyper_dropout(x, key, *, p=0.5, n_divs=1, training=True):
    """JAX/Pallas equivalent of HyperDropout.forward with dim=-1."""
    if p < 0.0 or p > 1.0:
        raise ValueError(
            "dropout probability has to be between 0 and 1, but got {}".format(p)
        )
    if not training or p == 0.0:
        return x
    if p == 1.0:
        # keep_prob == 0: everything is dropped; avoid 0 * inf = NaN.
        return jnp.zeros_like(x)

    orig_shape = x.shape
    F = orig_shape[-1]
    assert F % n_divs == 0, "last dim must be divisible by n_divs"
    sub = F // n_divs

    # Flatten leading dims: dim=-1 semantics are unchanged by this reshape.
    x2 = x.reshape(-1, F)
    B = x2.shape[0]

    keep_prob = 1.0 - p
    thresh = int(round(keep_prob * (1 << 24)))
    scale = 1.0 / keep_prob

    # Shared random bits for the reduced mask shape (B, sub).
    bits = jax.random.randint(key, (B, sub), 0, 1 << 24, dtype=jnp.int32)

    TB = _choose_row_tile(B, F, jnp.dtype(x.dtype).itemsize)
    nb = pl.cdiv(B, TB)

    kernel = functools.partial(
        _hyper_dropout_kernel, thresh=thresh, scale=scale, n_divs=n_divs, sub=sub
    )

    out = pl.pallas_call(
        kernel,
        out_shape=jax.ShapeDtypeStruct((B, F), x.dtype),
        grid=(nb,),
        in_specs=[
            pl.BlockSpec((TB, sub), lambda i: (i, 0)),  # shared mask bits
            pl.BlockSpec((TB, F), lambda i: (i, 0)),    # x row tile (full F)
        ],
        out_specs=pl.BlockSpec((TB, F), lambda i: (i, 0)),
        compiler_params=pltpu.CompilerParams(
            dimension_semantics=("parallel",),
        ),
    )(bits, x2)

    return out.reshape(orig_shape)


if __name__ == "__main__":
    key = jax.random.PRNGKey(0)
    x_key, mask_key = jax.random.split(key)

    B, F = 8, 512
    n_divs = 4
    p = 0.5

    # Strictly positive input so the mask can be recovered for verification.
    x = jax.random.uniform(x_key, (B, F), dtype=jnp.float32) + 1.0

    out = hyper_dropout(x, mask_key, p=p, n_divs=n_divs, training=True)
    out = jax.block_until_ready(out)

    # --- light verification of HyperDropout semantics ---
    ratio = jnp.asarray(out) / jnp.asarray(x)  # either 0 or 1/(1-p)
    scale = 1.0 / (1.0 - p)
    is_zero = jnp.abs(ratio) < 1e-6
    is_scale = jnp.abs(ratio - scale) < 1e-4
    assert bool(jnp.all(is_zero | is_scale)), "mask values must be 0 or 1/(1-p)"

    # Mask must be identical across the n_divs chunks along the last axis.
    sub = F // n_divs
    chunks = ratio.reshape(B, n_divs, sub)
    assert bool(
        jnp.all(jnp.abs(chunks - chunks[:, :1, :]) < 1e-4)
    ), "mask must repeat across the n_divs hypercomplex components"

    # Some elements kept, some dropped (p=0.5 over 1024 mask entries).
    assert bool(jnp.any(is_zero)) and bool(jnp.any(is_scale))

    # Eval mode is identity; p=1 is all zeros.
    out_eval = hyper_dropout(x, mask_key, p=p, n_divs=n_divs, training=False)
    assert bool(jnp.all(out_eval == x))
    out_p1 = hyper_dropout(x, mask_key, p=1.0, n_divs=n_divs, training=True)
    assert bool(jnp.all(out_p1 == 0))

    print("KERNEL_OK")
</pallas_src>

<mosaic_0001>
module attributes {stable_mosaic.version = 11 : i64} {
  func.func @_hyper_dropout_kernel(%arg0: i32, %arg1: memref<8x128xi32, #tpu.memory_space<vmem>>, %arg2: memref<8x512xf32, #tpu.memory_space<vmem>>, %arg3: memref<8x512xf32, #tpu.memory_space<vmem>>) attributes {dimension_semantics = [#tpu.dimension_semantics<parallel>], iteration_bounds = array<i64: 1>, scalar_prefetch = 0 : i64, scratch_operands = 0 : i64, tpu.core_type = #tpu.core_type<tc>, window_params = [{transform_indices = @transform_0, window_bounds = array<i64: 8, 128>}, {transform_indices = @transform_1, window_bounds = array<i64: 8, 512>}, {transform_indices = @transform_2, window_bounds = array<i64: 8, 512>}]} {
    %c0 = arith.constant 0 : index
    %c0_0 = arith.constant 0 : index
    %0 = vector.load %arg1[%c0, %c0_0] : memref<8x128xi32, #tpu.memory_space<vmem>>, vector<8x128xi32>
    %c8388608_i32 = arith.constant 8388608 : i32
    %1 = vector.broadcast %c8388608_i32 : i32 to vector<8x128xi32>
    %2 = arith.cmpi slt, %0, %1 : vector<8x128xi32>
    %cst = arith.constant 2.000000e+00 : f32
    %cst_1 = arith.constant 0.000000e+00 : f32
    %3 = vector.broadcast %cst : f32 to vector<8x128xf32>
    %4 = vector.broadcast %cst_1 : f32 to vector<8x128xf32>
    %5 = arith.select %2, %3, %4 : vector<8x128xi1>, vector<8x128xf32>
    %c0_2 = arith.constant 0 : index
    %c0_3 = arith.constant 0 : index
    %6 = vector.load %arg2[%c0_2, %c0_3] : memref<8x512xf32, #tpu.memory_space<vmem>>, vector<8x128xf32>
    %7 = arith.mulf %6, %5 : vector<8x128xf32>
    %c0_4 = arith.constant 0 : index
    %c0_5 = arith.constant 0 : index
    %8 = vector.load %arg3[%c0_4, %c0_5] : memref<8x512xf32, #tpu.memory_space<vmem>>, vector<8x128xf32>
    tpu.vector_store %arg3[%c0_4, %c0_5], %7 {strides = array<i32>} : memref<8x512xf32, #tpu.memory_space<vmem>>, vector<8x128xf32>,
    %c0_6 = arith.constant 0 : index
    %c128 = arith.constant 128 : index
    %9 = vector.load %arg2[%c0_6, %c128] : memref<8x512xf32, #tpu.memory_space<vmem>>, vector<8x128xf32>
    %10 = arith.mulf %9, %5 : vector<8x128xf32>
    %c0_7 = arith.constant 0 : index
    %c128_8 = arith.constant 128 : index
    %11 = vector.load %arg3[%c0_7, %c128_8] : memref<8x512xf32, #tpu.memory_space<vmem>>, vector<8x128xf32>
    tpu.vector_store %arg3[%c0_7, %c128_8], %10 {strides = array<i32>} : memref<8x512xf32, #tpu.memory_space<vmem>>, vector<8x128xf32>,
    %c0_9 = arith.constant 0 : index
    %c256 = arith.constant 256 : index
    %12 = vector.load %arg2[%c0_9, %c256] : memref<8x512xf32, #tpu.memory_space<vmem>>, vector<8x128xf32>
    %13 = arith.mulf %12, %5 : vector<8x128xf32>
    %c0_10 = arith.constant 0 : index
    %c256_11 = arith.constant 256 : index
    %14 = vector.load %arg3[%c0_10, %c256_11] : memref<8x512xf32, #tpu.memory_space<vmem>>, vector<8x128xf32>
    tpu.vector_store %arg3[%c0_10, %c256_11], %13 {strides = array<i32>} : memref<8x512xf32, #tpu.memory_space<vmem>>, vector<8x128xf32>,
    %c0_12 = arith.constant 0 : index
    %c384 = arith.constant 384 : index
    %15 = vector.load %arg2[%c0_12, %c384] : memref<8x512xf32, #tpu.memory_space<vmem>>, vector<8x128xf32>
    %16 = arith.mulf %15, %5 : vector<8x128xf32>
    %c0_13 = arith.constant 0 : index
    %c384_14 = arith.constant 384 : index
    %17 = vector.load %arg3[%c0_13, %c384_14] : memref<8x512xf32, #tpu.memory_space<vmem>>, vector<8x128xf32>
    tpu.vector_store %arg3[%c0_13, %c384_14], %16 {strides = array<i32>} : memref<8x512xf32, #tpu.memory_space<vmem>>, vector<8x128xf32>,
    return
  }
  func.func @transform_0(%arg0: i32) -> (i32, i32) {
    %c0_i32 = arith.constant 0 : i32
    %c0_i32_0 = arith.constant 0 : i32
    return %arg0, %c0_i32 : i32, i32
  }
  func.func @transform_1(%arg0: i32) -> (i32, i32) {
    %c0_i32 = arith.constant 0 : i32
    %c0_i32_0 = arith.constant 0 : i32
    return %arg0, %c0_i32 : i32, i32
  }
  func.func @transform_2(%arg0: i32) -> (i32, i32) {
    %c0_i32 = arith.constant 0 : i32
    %c0_i32_0 = arith.constant 0 : i32
    return %arg0, %c0_i32 : i32, i32
  }
}

</mosaic_0001>

<bundles_post_ra>
// kernel: tpu_custom_call.1
= control target key start
LH: loop header
LB: loop body
LE: loop exit
PB: predicated region body
PF: predicated region fallthrough
CT: control target
= control target key end

     0   :  { %7 = vsyncpa [#allocation3], 0  ;;  %s198_s0 = inlined_call_operand.hbm [shape: s32[8,128], index: 0, kind: input, shape index: {}]   ;;  %s199_s1 = inlined_call_operand.hbm [shape: f32[8,512], index: 1, kind: input, shape index: {}]   ;;  %s200_s2 = inlined_call_operand.hbm [shape: f32[8,512], index: 2, kind: output, shape index: {}]  }
   0x1   :  { %8 = vsyncpa [#allocation6], 0 }
   0x2   :  { %9 = vsyncpa [#allocation4], 0  ;;  %s143_s9 = smov [#allocation2]   ;;  %s144_s11 = smov [#allocation5]  }
   0x3   :  { %s16_s10 = sshll.u32 %s143_s9, 4  ;;  %s26_s12 = sshll.u32 %s144_s11, 4  ;;  %s17_s10 = int_to_ptr.vmem [resolvable:$true] %s16_s10  ;;  %s27_s12 = int_to_ptr.vmem [resolvable:$true] %s26_s12 }
   0x4   :  { %s71_s15 = scalar_lea.hbm %s198_s0, 128 }
   0x5   :  { %p72_p0 = scmp.ne.s32.totalorder %s198_s0, %s71_s15  ;;  %p75_p1 = scmp.lt.u32.totalorder %s71_s15, %s198_s0 }
   0x7   :  { %p77_p2 = pnand %p75_p1, %p72_p0 }
   0x9   :  { %80 = shalt.err (!%p77_p2)
}
   0xa   :  { %s81_s20 = scalar_lea.vmem %s17_s10, 128  ;;  %p86_p4 = scmp.lt.s32.totalorder %s17_s10, %s17_s10 }
   0xb   :  { %p82_p3 = scmp.ne.s32.totalorder %s17_s10, %s81_s20  ;;  %p87_p5 = scmp.lt.s32.totalorder %s81_s20, %s81_s20 }
   0xd   :  { %p88_p6 = por %p87_p5, %p86_p4 }
   0xf   :  { %p89_p7 = pnand %p88_p6, %p82_p3 }
  0x11   :  { %92 = shalt.err (!%p89_p7)
}
  0x12   :  { %19 = dma.hbm_to_vmem [thread:$0]  %s198_s0, 128, %s17_s10, [#allocation3]  }
  0x13   :  { %s93_s25 = scalar_lea.hbm %s199_s1, 512 }
  0x14   :  { %p94_p8 = scmp.ne.s32.totalorder %s199_s1, %s93_s25  ;;  %p97_p9 = scmp.lt.u32.totalorder %s93_s25, %s199_s1 }
  0x16   :  { %p99_p10 = pnand %p97_p9, %p94_p8 }
  0x18   :  { %102 = shalt.err (!%p99_p10)
}
  0x19   :  { %s103_s30 = scalar_lea.vmem %s27_s12, 512  ;;  %p108_p12 = scmp.lt.s32.totalorder %s27_s12, %s27_s12 }
  0x1a   :  { %p104_p11 = scmp.ne.s32.totalorder %s27_s12, %s103_s30  ;;  %p109_p13 = scmp.lt.s32.totalorder %s103_s30, %s103_s30 }
  0x1c   :  { %p110_p0 = por %p109_p13, %p108_p12 }
  0x1e   :  { %p111_p1 = pnand %p110_p0, %p104_p11 }
  0x20   :  { %114 = shalt.err (!%p111_p1)
}
  0x21   :  { %29 = dma.hbm_to_vmem [thread:$0]  %s199_s1, 512, %s27_s12, [#allocation6]  }
  0x22   :  { %137 = dma.done.wait [#allocation3], 128  }
  0x23   :  { %138 = vsyncadd [#allocation3], 4294967168 }
  0x24   :  { %139 = dma.done.wait [#allocation6], 512  }
  0x25   :  { %140 = vsyncadd [#allocation6], 4294966784  ;;  %v36_v0 = vld [vmem:[#allocation2] sm:$0xff]  ;;  %v39_v1 = vld [vmem:[#allocation5] sm:$0xff]  ;;  %s145_s4 = smov [#allocation7]   ;;  %v146_v5 = vmov 0.0  }
  0x26   :  { %v42_v2 = vld [vmem:[#allocation5 + $0x8] sm:$0xff]  ;;  %s57_s5 = sshll.u32 %s145_s4, 4  ;;  %vm37_vm0 = vcmp.lt.s32.totalorder %v36_v0, 8388608  ;;  %v45_v3 = vld [vmem:[#allocation5 + $0x10] sm:$0xff]  ;;  %v48_v4 = vld [vmem:[#allocation5 + $0x18] sm:$0xff]  ;;  %s58_s5 = int_to_ptr.vmem [resolvable:$true] %s57_s5 }
  0x27   :  { %v38_v6 = vsel %vm37_vm0, 2.0, %v146_v5  ;;  %s115_s1 = scalar_lea.vmem %s58_s5, 512  ;;  %p120_p3 = scmp.lt.s32.totalorder %s58_s5, %s58_s5 }
  0x28   :  { %v40_v7 = vmul.f32 %v39_v1, %v38_v6  ;;  %v43_v8 = vmul.f32 %v42_v2, %v38_v6  ;;  %v46_v9 = vmul.f32 %v45_v3, %v38_v6  ;;  %v49_v10 = vmul.f32 %v48_v4, %v38_v6  ;;  %p116_p2 = scmp.ne.s32.totalorder %s58_s5, %s115_s1  ;;  %p121_p4 = scmp.lt.s32.totalorder %s115_s1, %s115_s1 }
  0x2a   :  { %41 = vst [vmem:[#allocation7] sm:$0xff] %v40_v7  ;;  %44 = vst [vmem:[#allocation7 + $0x8] sm:$0xff] %v43_v8  ;;  %p122_p5 = por %p121_p4, %p120_p3 }
  0x2b   :  { %47 = vst [vmem:[#allocation7 + $0x10] sm:$0xff] %v46_v9  ;;  %50 = vst [vmem:[#allocation7 + $0x18] sm:$0xff] %v49_v10 }
  0x2c   :  { %p123_p6 = pnand %p122_p5, %p116_p2 }
  0x2e   :  { %126 = shalt.err (!%p123_p6)
}
  0x2f   :  { %s127_s8 = scalar_lea.hbm %s200_s2, 512 }
  0x30   :  { %p128_p7 = scmp.ne.s32.totalorder %s200_s2, %s127_s8  ;;  %p131_p8 = scmp.lt.u32.totalorder %s127_s8, %s200_s2 }
  0x32   :  { %p133_p9 = pnand %p131_p8, %p128_p7 }
  0x34   :  { %136 = shalt.err (!%p133_p9)
}
  0x35   :  { %60 = dma.vmem_to_hbm [thread:$0]  %s58_s5, 512, %s200_s2, [#allocation4]  }
  0x36   :  { %141 = dma.done.wait [#allocation4], 512  }
  0x37   :  { %142 = vsyncadd [#allocation4], 4294966784 }
  0x38   :  { %64 = vsyncpa [#allocation3], 1 }
  0x39   :  { %65 = vsyncpa [#allocation6], 1 }
  0x3a   :  { %66 = vsyncpa [#allocation4], 1 }

</bundles_post_ra>
